<compile_context>
chip_gen: v7x
topology: tpu7x:2x2x1
jax: 0.10.0
libtpu: 0.0.40
codegen_flags: <defaults>
</compile_context>

<pallas_src>
import functools

import jax
import jax.numpy as jnp
from jax.experimental import pallas as pl
from jax.experimental.pallas import tpu as pltpu

EPS = 1e-12  # matches torch F.normalize default eps


def _ada_rmsnorm_kernel(x_ref, cond_ref, w_ref, o_ref, *, scale):
    # x_ref:    (tn, D)   row tile
    # cond_ref: (tn, Dc)  row tile (bf16 by default)
    # w_ref:    (Dc, D)   full transposed weight, resident across the grid
    # o_ref:    (tn, D)
    #
    # gamma = cond @ W_t : native-dtype MXU matmul with f32 accumulation.
    gamma = jnp.dot(
        cond_ref[...], w_ref[...], preferred_element_type=jnp.float32
    )

    # l2norm along last dim in f32:
    #   x * rsqrt(max(sum(x^2), eps^2)) * sqrt(D)
    # rsqrt(max(sumsq, eps^2)) == 1 / max(||x||_2, eps) (sqrt is monotone),
    # so this matches torch F.normalize semantics exactly.
    x = x_ref[...].astype(jnp.float32)
    sumsq = jnp.sum(x * x, axis=-1, keepdims=True)
    inv_scaled = jax.lax.rsqrt(jnp.maximum(sumsq, EPS * EPS)) * scale  # (tn,1)
    normed = x * inv_scaled

    o_ref[...] = (normed * (gamma + 1.0)).astype(o_ref.dtype)


def _round_up(v, m):
    return ((v + m - 1) // m) * m


def _round_down(v, m):
    return (v // m) * m


def _vmem_capacity_bytes():
    try:
        return int(pltpu.get_tpu_info().vmem_capacity_bytes)
    except Exception:
        return 64 << 20  # conservative fallback (v7x per-TensorCore)


def _weight_block_spec(Dc, D):
    # Grid-invariant weight block: constant index_map -> fetched once and kept
    # resident.  Single-buffer it to halve its VMEM footprint (zero BW cost).
    try:
        return pl.BlockSpec(
            (Dc, D), lambda i: (0, 0), pipeline_mode=pl.Buffered(1)
        )
    except TypeError:  # older jax without pipeline_mode kwarg
        return pl.BlockSpec((Dc, D), lambda i: (0, 0))


def ada_rmsnorm(x, cond, w_t, *, block_rows=None, mxu_dtype=jnp.bfloat16):
    """x: (B, S, D), cond: (B, S, Dc), w_t: (Dc, D) — returns (B, S, D).

    block_rows: row-tile size; if None it is picked from the chip's VMEM
    capacity (512 on 128 MiB parts, 256 on 64 MiB parts) and then shrunk so
    tiles + resident weight + f32 intermediates fit the scoped-VMEM limit.
    mxu_dtype: dtype the gamma matmul operands (cond, w_t) are cast to before
    the kernel (bf16 by default; accumulation stays f32). None = no cast.
    """
    B, S, D = x.shape
    Dc = cond.shape[-1]
    assert cond.shape[:2] == (B, S)
    assert w_t.shape == (Dc, D)

    N = B * S
    x2 = x.reshape(N, D)
    c2 = cond.reshape(N, Dc)
    if mxu_dtype is not None:
        c2 = c2.astype(mxu_dtype)
        w_t = w_t.astype(mxu_dtype)

    itemsize_x = jnp.dtype(x2.dtype).itemsize
    itemsize_c = jnp.dtype(c2.dtype).itemsize
    itemsize_w = jnp.dtype(w_t.dtype).itemsize
    itemsize_o = itemsize_x

    # Sublane packing for the row axis: 8 rows for 32-bit, 16 for bf16,
    # 32 for 8-bit operands.
    sub = 8 * max(1, 4 // min(itemsize_x, itemsize_c))

    vmem_cap = _vmem_capacity_bytes()
    if block_rows is None:
        block_rows = 512 if vmem_cap >= (100 << 20) else 256

    # VMEM budget model:
    #   double-buffered x / cond / out row tiles
    # + single-buffered resident weight
    # + f32 in-kernel intermediates (~4 copies of a (tn, D) f32 tile:
    #   gamma, f32 x, normed, product)
    weight_bytes = Dc * D * itemsize_w
    per_row_bytes = (
        2 * (D * itemsize_x + Dc * itemsize_c + D * itemsize_o) + 4 * D * 4
    )
    fixed_headroom = 2 << 20
    usable_vmem = vmem_cap - (8 << 20)
    row_budget = usable_vmem - weight_bytes - fixed_headroom
    # TODO(synk): if weight_bytes alone dominates VMEM (very large Dc*D on
    # v7x), switch to a trailing "arbitrary" Dc-chunk grid axis with a
    # (tn, D) f32 gamma accumulator instead of keeping the weight resident.
    tn_cap = max(
        sub,
        _round_down(max(row_budget, per_row_bytes * sub) // per_row_bytes, sub),
    )

    tn = max(sub, min(_round_up(block_rows, sub), _round_up(N, sub)))
    tn = min(tn, tn_cap)

    need_bytes = tn * per_row_bytes + weight_bytes + fixed_headroom
    vmem_limit = int(min(max(need_bytes, 32 << 20), usable_vmem))

    scale = float(D) ** 0.5
    grid = (pl.cdiv(N, tn),)

    # NOTE: for real model dims D is a multiple of 128 so the output is
    # lane-dense; the demo D=32 (full array dim) is legal but uses masked
    # stores and is not representative of production shapes.
    out = pl.pallas_call(
        functools.partial(_ada_rmsnorm_kernel, scale=scale),
        out_shape=jax.ShapeDtypeStruct((N, D), x.dtype),
        grid_spec=pltpu.PrefetchScalarGridSpec(
            num_scalar_prefetch=0,
            grid=grid,
            in_specs=[
                pl.BlockSpec((tn, D), lambda i: (i, 0)),
                pl.BlockSpec((tn, Dc), lambda i: (i, 0)),
                _weight_block_spec(Dc, D),
            ],
            out_specs=pl.BlockSpec((tn, D), lambda i: (i, 0)),
        ),
        compiler_params=pltpu.CompilerParams(
            # "parallel" lets the runtime shard the row axis across v7x's two
            # TensorCores; on v5e/v6e (1 TC) it is a no-op.
            dimension_semantics=("parallel",),
            vmem_limit_bytes=vmem_limit,
        ),
    )(x2, c2, w_t)

    return out.reshape(B, S, D)


def ada_rmsnorm_reference(x, cond, w_t):
    x = x.astype(jnp.float32)
    cond = cond.astype(jnp.float32)
    w_t = w_t.astype(jnp.float32)
    scale = float(x.shape[-1]) ** 0.5
    norm = jnp.sqrt(jnp.sum(x * x, axis=-1, keepdims=True))
    normed = x / jnp.maximum(norm, EPS) * scale
    gamma = cond @ w_t
    return normed * (gamma + 1.0)


if __name__ == "__main__":
    B, S, D = 2, 8, 32
    Dc = D  # default(dim_cond, dim)

    key = jax.random.PRNGKey(0)
    kx, kc, kw = jax.random.split(key, 3)
    x = jax.random.normal(kx, (B, S, D), dtype=jnp.float32)
    cond = jax.random.normal(kc, (B, S, Dc), dtype=jnp.float32)

    # 1) Linear(dim_cond, dim, bias=False) with nn.init.zeros_ (as in __init__):
    #    gamma == 0, output == l2norm(x) * sqrt(D).  Exact regardless of the
    #    bf16 MXU cast.
    w_zero = jnp.zeros((Dc, D), dtype=jnp.float32)
    out0 = jax.block_until_ready(ada_rmsnorm(x, cond, w_zero))
    ref0 = ada_rmsnorm_reference(x, cond, w_zero)
    assert out0.shape == (B, S, D)
    assert jnp.allclose(out0, ref0, atol=1e-5, rtol=1e-5), "mismatch (zero W)"

    # 2) Non-zero weight, default bf16 MXU operands (f32 accumulation).
    #    Compare against a reference with the same bf16 operand cast.
    w_t = 0.02 * jax.random.normal(kw, (Dc, D), dtype=jnp.float32)
    out1 = jax.block_until_ready(ada_rmsnorm(x, cond, w_t))
    ref1 = ada_rmsnorm_reference(
        x, cond.astype(jnp.bfloat16), w_t.astype(jnp.bfloat16)
    )
    assert jnp.allclose(out1, ref1, atol=1e-3, rtol=1e-3), "mismatch (rand W, bf16 MXU)"

    # 2b) Exactness check of the f32 path (mxu_dtype=None).
    out1f = jax.block_until_ready(ada_rmsnorm(x, cond, w_t, mxu_dtype=None))
    ref1f = ada_rmsnorm_reference(x, cond, w_t)
    assert jnp.allclose(out1f, ref1f, atol=1e-5, rtol=1e-5), "mismatch (rand W, f32 MXU)"

    # 3) bf16 inputs fed natively to the MXU.
    xb = x.astype(jnp.bfloat16)
    cb = cond.astype(jnp.bfloat16)
    wb = w_t.astype(jnp.bfloat16)
    out2 = jax.block_until_ready(ada_rmsnorm(xb, cb, wb))
    ref2 = ada_rmsnorm_reference(xb, cb, wb)
    assert jnp.allclose(
        out2.astype(jnp.float32), ref2, atol=5e-2, rtol=5e-2
    ), "mismatch (bf16)"

    print("KERNEL_OK")
</pallas_src>

<mosaic_0001>
module attributes {stable_mosaic.version = 11 : i64} {
  func.func @_ada_rmsnorm_kernel(%arg0: i32, %arg1: memref<16x32xf32, #tpu.memory_space<vmem>>, %arg2: memref<16x32xbf16, #tpu.memory_space<vmem>>, %arg3: memref<32x32xbf16, #tpu.memory_space<vmem>>, %arg4: memref<16x32xf32, #tpu.memory_space<vmem>>) attributes {dimension_semantics = [#tpu.dimension_semantics<parallel>], iteration_bounds = array<i64: 1>, scalar_prefetch = 0 : i64, scratch_operands = 0 : i64, tpu.core_type = #tpu.core_type<tc>, window_params = [{transform_indices = @transform_0, window_bounds = array<i64: 16, 32>}, {transform_indices = @transform_1, window_bounds = array<i64: 16, 32>}, {pipeline_mode = #tpu.pipeline_mode<synchronous>, transform_indices = @transform_2, window_bounds = array<i64: 32, 32>}, {transform_indices = @transform_3, window_bounds = array<i64: 16, 32>}]} {
    %c0 = arith.constant 0 : index
    %c0_0 = arith.constant 0 : index
    %0 = vector.load %arg2[%c0, %c0_0] : memref<16x32xbf16, #tpu.memory_space<vmem>>, vector<16x32xbf16>
    %c0_1 = arith.constant 0 : index
    %c0_2 = arith.constant 0 : index
    %1 = vector.load %arg3[%c0_1, %c0_2] : memref<32x32xbf16, #tpu.memory_space<vmem>>, vector<32x32xbf16>
    %cst = arith.constant dense<0.000000e+00> : vector<16x32xf32>
    %2 = tpu.matmul %0, %1, %cst {dimension_numbers = #tpu.dot_dimension_numbers<[1], [0], [0], [1], [0, 0, 1, 1], [], []>} : vector<16x32xbf16>, vector<32x32xbf16>, vector<16x32xf32> -> vector<16x32xf32>
    %c0_3 = arith.constant 0 : index
    %c0_4 = arith.constant 0 : index
    %3 = vector.load %arg1[%c0_3, %c0_4] : memref<16x32xf32, #tpu.memory_space<vmem>>, vector<16x32xf32>
    %4 = arith.mulf %3, %3 : vector<16x32xf32>
    %cst_5 = arith.constant dense<0.000000e+00> : vector<16xf32>
    %5 = vector.multi_reduction <add>, %4, %cst_5 [1] : vector<16x32xf32> to vector<16xf32>
    %6 = vector.shape_cast %5 : vector<16xf32> to vector<16x1xf32>
    %cst_6 = arith.constant 1.000000e-24 : f32
    %7 = vector.broadcast %cst_6 : f32 to vector<16x1xf32>
    %8 = arith.maximumf %6, %7 : vector<16x1xf32>
    %9 = math.rsqrt %8 : vector<16x1xf32>
    %cst_7 = arith.constant 5.65685415 : f32
    %10 = vector.broadcast %cst_7 : f32 to vector<16x1xf32>
    %11 = arith.mulf %9, %10 : vector<16x1xf32>
    %12 = vector.broadcast %11 : vector<16x1xf32> to vector<16x32xf32>
    %13 = arith.mulf %3, %12 : vector<16x32xf32>
    %cst_8 = arith.constant 1.000000e+00 : f32
    %14 = vector.broadcast %cst_8 : f32 to vector<16x32xf32>
    %15 = arith.addf %2, %14 : vector<16x32xf32>
    %16 = arith.mulf %13, %15 : vector<16x32xf32>
    %c0_9 = arith.constant 0 : index
    %c0_10 = arith.constant 0 : index
    %17 = vector.load %arg4[%c0_9, %c0_10] : memref<16x32xf32, #tpu.memory_space<vmem>>, vector<16x32xf32>
    tpu.vector_store %arg4[%c0_9, %c0_10], %16 {strides = array<i32>} : memref<16x32xf32, #tpu.memory_space<vmem>>, vector<16x32xf32>,
    return
  }
  func.func @transform_0(%arg0: i32) -> (i32, i32) {
    %c0_i32 = arith.constant 0 : i32
    %c0_i32_0 = arith.constant 0 : i32
    return %arg0, %c0_i32 : i32, i32
  }
  func.func @transform_1(%arg0: i32) -> (i32, i32) {
    %c0_i32 = arith.constant 0 : i32
    %c0_i32_0 = arith.constant 0 : i32
    return %arg0, %c0_i32 : i32, i32
  }
  func.func @transform_2(%arg0: i32) -> (i32, i32) {
    %c0_i32 = arith.constant 0 : i32
    %c0_i32_0 = arith.constant 0 : i32
    %c0_i32_1 = arith.constant 0 : i32
    return %c0_i32, %c0_i32_0 : i32, i32
  }
  func.func @transform_3(%arg0: i32) -> (i32, i32) {
    %c0_i32 = arith.constant 0 : i32
    %c0_i32_0 = arith.constant 0 : i32
    return %arg0, %c0_i32 : i32, i32
  }
}

</mosaic_0001>

<bundles_post_ra>
// kernel: tpu_custom_call.1
= control target key start
LH: loop header
LB: loop body
LE: loop exit
PB: predicated region body
PF: predicated region fallthrough
CT: control target
= control target key end

     0   :  { %8 = vsyncpa [#allocation3], 0  ;;  %s386_s0 = inlined_call_operand.hbm [shape: f32[16,32], index: 0, kind: input, shape index: {}]   ;;  %s387_s1 = inlined_call_operand.hbm [shape: bf16[16,32], index: 1, kind: input, shape index: {}]   ;;  %s388_s2 = inlined_call_operand.hbm [shape: bf16[32,32], index: 2, kind: input, shape index: {}]   ;;  %s389_s3 = inlined_call_operand.hbm [shape: f32[16,32], index: 3, kind: output, shape index: {}]  }
   0x1   :  { %9 = vsyncpa [#allocation6], 0 }
   0x2   :  { %10 = vsyncpa [#allocation4], 0  ;;  %s291_s12 = smov [#allocation5]   ;;  %s197_s16 = scalar_lea.hbm %s387_s1, 128 }
   0x3   :  { %s28_s13 = sshll.u32 %s291_s12, 4  ;;  %p198_p0 = scmp.ne.s32.totalorder %s387_s1, %s197_s16  ;;  %s29_s13 = int_to_ptr.vmem [resolvable:$true] %s28_s13 }
   0x4   :  { %p201_p1 = scmp.lt.u32.totalorder %s197_s16, %s387_s1 }
   0x6   :  { %p203_p2 = pnand %p201_p1, %p198_p0 }
   0x8   :  { %206 = shalt.err (!%p203_p2)
}
   0x9   :  { %s207_s21 = scalar_lea.vmem %s29_s13, 128  ;;  %p212_p4 = scmp.lt.s32.totalorder %s29_s13, %s29_s13 }
   0xa   :  { %p208_p3 = scmp.ne.s32.totalorder %s29_s13, %s207_s21  ;;  %p213_p5 = scmp.lt.s32.totalorder %s207_s21, %s207_s21 }
   0xc   :  { %p214_p6 = por %p213_p5, %p212_p4 }
   0xe   :  { %p215_p7 = pnand %p214_p6, %p208_p3 }
  0x10   :  { %218 = shalt.err (!%p215_p7)
}
  0x11   :  { %s292_s22 = smov 64   ;;  %s293_s23 = smov 4  }
  0x12   :  { %34 = dma.hbm_to_vmem [thread:$0]  %s387_s1, 128, %s29_s13, [#allocation6], %s292_s22, %s292_s22, %s293_s23  }
  0x13   :  { %s294_s26 = smov [#allocation2]   ;;  %s219_s30 = scalar_lea.hbm %s386_s0, 256 }
  0x14   :  { %s16_s27 = sshll.u32 %s294_s26, 4  ;;  %p220_p8 = scmp.ne.s32.totalorder %s386_s0, %s219_s30  ;;  %s17_s27 = int_to_ptr.vmem [resolvable:$true] %s16_s27 }
  0x15   :  { %p223_p9 = scmp.lt.u32.totalorder %s219_s30, %s386_s0 }
  0x17   :  { %p225_p10 = pnand %p223_p9, %p220_p8 }
  0x19   :  { %228 = shalt.err (!%p225_p10)
}
  0x1a   :  { %s229_s8 = scalar_lea.vmem %s17_s27, 256  ;;  %p234_p12 = scmp.lt.s32.totalorder %s17_s27, %s17_s27 }
  0x1b   :  { %p230_p11 = scmp.ne.s32.totalorder %s17_s27, %s229_s8  ;;  %p235_p13 = scmp.lt.s32.totalorder %s229_s8, %s229_s8 }
  0x1d   :  { %p236_p0 = por %p235_p13, %p234_p12 }
  0x1f   :  { %p237_p1 = pnand %p236_p0, %p230_p11 }
  0x21   :  { %240 = shalt.err (!%p237_p1)
}
  0x22   :  { %s295_s1 = smov 128   ;;  %s296_s9 = smov 8  }
  0x23   :  { %22 = dma.hbm_to_vmem [thread:$0]  %s386_s0, 256, %s17_s27, [#allocation3], %s295_s1, %s295_s1, %s296_s9  }
  0x24   :  { %s297_s12 = smov [#allocation7]   ;;  %s241_s16 = scalar_lea.hbm %s388_s2, 256 }
  0x25   :  { %s40_s13 = sshll.u32 %s297_s12, 4  ;;  %p242_p2 = scmp.ne.s32.totalorder %s388_s2, %s241_s16  ;;  %s41_s13 = int_to_ptr.vmem [resolvable:$true] %s40_s13 }
  0x26   :  { %p245_p3 = scmp.lt.u32.totalorder %s241_s16, %s388_s2 }
  0x28   :  { %p247_p4 = pnand %p245_p3, %p242_p2 }
  0x2a   :  { %250 = shalt.err (!%p247_p4)
}
  0x2b   :  { %s251_s21 = scalar_lea.vmem %s41_s13, 256  ;;  %p256_p6 = scmp.lt.s32.totalorder %s41_s13, %s41_s13 }
  0x2c   :  { %p252_p5 = scmp.ne.s32.totalorder %s41_s13, %s251_s21  ;;  %p257_p7 = scmp.lt.s32.totalorder %s251_s21, %s251_s21 }
  0x2e   :  { %p258_p8 = por %p257_p7, %p256_p6 }
  0x30   :  { %p259_p9 = pnand %p258_p8, %p252_p5 }
  0x32   :  { %262 = shalt.err (!%p259_p9)
}
  0x33   :  { %46 = dma.hbm_to_vmem [thread:$0]  %s388_s2, 256, %s41_s13, [#allocation6], %s292_s22, %s292_s22, %s293_s23  }
  0x34   :  { %285 = dma.done.wait [#allocation3], 256  }
  0x35   :  { %286 = vsyncadd [#allocation3], 4294967040 }
  0x36   :  { %287 = dma.done.wait [#allocation6], 384  }
  0x37   :  { %288 = vsyncadd [#allocation6], 4294966912  ;;  %v298_v0 = vmov 0.0   ;;  %vm299_vm0 = vmmov 0   ;;  %v190_v1 = vld [vmem:[#allocation7] sm:$0xff]   ;;  %v191_v2 = vld [vmem:[#allocation7 + $0x8] sm:$0xff]  }
  0x38   :  { %172 = vmatprep.subr.bf16.mxu0 %v298_v0  ;;  %176 = vmatprep.mubr.msk.bf16.mxu0 %vm299_vm0, %v298_v0  ;;  %v63_v3 = vld [vmem:[#allocation2] sm:$0xff]  ;;  %v64_v4 = vld [vmem:[#allocation2 + $0x8] sm:$0xff]  ;;  %vm67_vm1 = vcmask 261120   ;;  %v192_v7 = vld [vmem:[#allocation5] sm:$0xff]   ;;  %s300_s2 = smov [#allocation8]  }
  0x39   :  { %173 = vmatpush3.bf16.msra.mxu0 %v190_v1  ;;  %v65_v5 = vmul.f32 %v63_v3, %v63_v3  ;;  %v66_v6 = vmul.f32 %v64_v4, %v64_v4  ;;  %s152_s22 = sshll.u32 %s300_s2, 4  ;;  %s153_s22 = int_to_ptr.vmem [resolvable:$true] %s152_s22 }
  0x3a   :  { %174 = vmatprep.subr.bf16.mxu0 %v298_v0  ;;  %s263_s23 = scalar_lea.vmem %s153_s22, 256  ;;  %p268_p11 = scmp.lt.s32.totalorder %s153_s22, %s153_s22 }
  0x3b   :  { %v68_v8 = vsel %vm67_vm1, %v65_v5, 0.0  ;;  %v71_v9 = vsel %vm67_vm1, %v66_v6, 0.0  ;;  %p264_p10 = scmp.ne.s32.totalorder %s153_s22, %s263_s23  ;;  %p269_p12 = scmp.lt.s32.totalorder %s263_s23, %s263_s23 }
  0x3c   :  { %69 = vadd.xlane.f32.xlu0 %v68_v8 }
  0x3d   :  { %175 = vmatpush3.bf16.msra.mxu0 %v191_v2  ;;  %p270_p13 = por %p269_p12, %p268_p11 }
  0x3f   :  { %p271_p0 = pnand %p270_p13, %p264_p10 }
  0x40   :  { %177 = vmatmul.mubr.msk.bf16.vlgmr.msra.gmra.mrb[0].mxu0 %vm67_vm1, %v192_v7  ;;  %72 = vadd.xlane.f32.xlu0 %v71_v9 }
  0xc9   :  { %v70_v10 = vpop.xlane.xlu0 %69 }
  0xca   :  { %v74_v12 = vmax.f32 %v70_v10, 1e-24 }
  0xcc   :  { %193 = vrsqrt.f32 %v74_v12 }
  0xcd   :  { %v73_v11 = vpop.xlane.xlu0 %72 }
  0xce   :  { %v75_v13 = vmax.f32 %v73_v11, 1e-24 }
  0xd0   :  { %195 = vrsqrt.f32 %v75_v13 }
  0xd6   :  { %v194_v14 = vpop.eup %193 }
  0xd7   :  { %v78_v16 = vmul.f32 5.656854, %v194_v14 }
  0xd9   :  { %v80_v19 = vmul.f32 %v78_v16, %v63_v3 }
  0xda   :  { %v196_v15 = vpop.eup %195 }
  0xdb   :  { %v79_v17 = vmul.f32 5.656854, %v196_v15 }
  0xdd   :  { %v81_v22 = vmul.f32 %v79_v17, %v64_v4 }
 0x113   :  { %v136_v18 = vpop.f32.mrb[0].mxu0 }
 0x114   :  { %v137_v20 = vadd.f32 1.0, %v136_v18  ;;  %v178_v21 = vpop.f32.mrb[1].mxu0 }
 0x115   :  { %v139_v23 = vpop.f32.mrb[2].mxu0 }
 0x116   :  { %v143_v24 = vmul.f32 %v137_v20, %v80_v19  ;;  %v140_v25 = vadd.f32 1.0, %v139_v23  ;;  %v179_v26 = vpop.f32.mrb[3].mxu0 }
 0x118   :  { %145 = vst.msk [vmem:[#allocation8] sm:$0xff] %vm67_vm1, %v143_v24  ;;  %v144_v27 = vmul.f32 %v140_v25, %v81_v22 }
 0x11a   :  { %146 = vst.msk [vmem:[#allocation8 + $0x8] sm:$0xff] %vm67_vm1, %v144_v27 }
 0x11b   :  { %274 = shalt.err (!%p271_p0)
}
 0x11c   :  { %s275_s27 = scalar_lea.hbm %s389_s3, 256 }
 0x11d   :  { %p276_p1 = scmp.ne.s32.totalorder %s389_s3, %s275_s27  ;;  %p279_p2 = scmp.lt.u32.totalorder %s275_s27, %s389_s3 }
 0x11f   :  { %p281_p3 = pnand %p279_p2, %p276_p1 }
 0x121   :  { %284 = shalt.err (!%p281_p3)
}
 0x122   :  { %158 = dma.vmem_to_hbm [thread:$0]  %s153_s22, 256, %s389_s3, [#allocation4], %s295_s1, %s295_s1, %s296_s9  }
 0x123   :  { %289 = dma.done.wait [#allocation4], 256  }
 0x124   :  { %290 = vsyncadd [#allocation4], 4294967040 }
 0x125   :  { %162 = vsyncpa [#allocation3], 1 }
 0x126   :  { %163 = vsyncpa [#allocation6], 1 }
 0x127   :  { %164 = vsyncpa [#allocation4], 1 }

</bundles_post_ra>
